<compile_context>
chip_gen: v7x
topology: tpu7x:2x2x1
jax: 0.10.0
libtpu: 0.0.40
codegen_flags: <defaults>
</compile_context>

<pallas_src>
import jax
import jax.numpy as jnp
from jax.experimental import pallas as pl
from jax.experimental.pallas import tpu as pltpu


HIDDEN = 128
N_ACTIONS = 2
LANES = 128


def _round_up(n, m):
    return ((n + m - 1) // m) * m


def _cdiv(a, b):
    return (a + b - 1) // b


def actor_kernel(xT_ref, w1a_ref, w2d_ref, b2d_ref, out_ref):
    # hT = relu(W1_aug @ x_aug^T): [H, S+1] @ [S+1, TB] -> [H, TB], f32 accumulate.
    # b1 rides in the augmented K column (x_aug's last row is all ones).
    hT = jnp.maximum(
        jnp.dot(w1a_ref[...], xT_ref[...], preferred_element_type=jnp.float32),
        0.0,
    )

    # 2-class softmax head == sigmoid of the logit difference:
    #   d = (w2[:,1]-w2[:,0]) . h + (b2[1]-b2[0]);  p1 = sigmoid(d), p0 = 1 - p1
    d = jnp.dot(w2d_ref[...], hT, preferred_element_type=jnp.float32) + b2d_ref[0, 0]

    # Numerically stable sigmoid pair (identical probabilities to the softmax).
    e = jnp.exp(-jnp.abs(d))        # arg <= 0: never overflows, single EUP exp
    inv = 1.0 / (1.0 + e)           # exact divide keeps tight parity with f32 softmax ref
    p_hi = inv                      # prob of the action with the larger logit
    p_lo = e * inv
    ge = d >= 0.0

    # Two direct lane-dense row stores (tb is a multiple of 128): no sublane
    # concat/relayout before the vst.
    out_ref[0:1, :] = jnp.where(ge, p_lo, p_hi).astype(out_ref.dtype)   # p(action 0)
    out_ref[1:2, :] = jnp.where(ge, p_hi, p_lo).astype(out_ref.dtype)   # p(action 1)


def _choose_batch_tile(B, tb_max):
    """Adaptive batch tile: big tiles (kernel is per-step-overhead bound),
    minimal tail padding, and an even tile count whenever more than one tile is
    needed so v7x's two TensorCores split the 'parallel' grid axis evenly.
    VMEM footprint at tb=4096 is only a few MiB, fine on v5e/v6e/v7x."""
    tb_max = max(LANES, _round_up(tb_max, LANES))
    Bp128 = _round_up(B, LANES)
    n_tiles = max(1, _cdiv(Bp128, tb_max))
    if n_tiles > 1 and n_tiles % 2 == 1:
        n_tiles += 1                      # v7x: give both TensorCores equal work
    tb = _round_up(_cdiv(B, n_tiles), LANES)
    return tb, n_tiles


def actor_forward(x, w1, b1, w2, b2, *, tb_max=4096, return_transposed=False):
    """softmax(relu(x @ w1 + b1) @ w2 + b2, axis=-1) as one Pallas TPU kernel.

    x: [B, S]   w1: [S, 128]   b1: [1,128] or [128]   w2: [128, 2]   b2: [1,2] or [2]
    Returns [B, 2] float32 action probabilities ([2, B] if return_transposed).
    """
    B, S = x.shape
    H = w1.shape[1]
    assert w1.shape == (S, H)
    assert w2.shape == (H, N_ACTIONS), "sigmoid-of-difference head assumes 2 actions"

    # Shape guards: accept (128,)/(1,128) biases and (2,)/(1,2) head biases.
    b1c = jnp.asarray(b1, jnp.float32).reshape(H, 1)
    b2f = jnp.asarray(b2, jnp.float32).reshape(-1)

    tb, n_tiles = _choose_batch_tile(B, tb_max)
    Bp = tb * n_tiles

    # One pad supplies BOTH the ones row (bias fold) and the batch tail padding.
    # Padded tail columns produce bounded garbage probabilities, sliced off below.
    xT = jnp.pad(x.T.astype(jnp.float32), ((0, 1), (0, Bp - B)),
                 constant_values=1.0)                                    # [S+1, Bp]

    w1a = jnp.concatenate([w1.T.astype(jnp.float32), b1c], axis=1)       # [H, S+1]
    w2d = (w2[:, 1] - w2[:, 0]).astype(jnp.float32).reshape(1, H)        # [1, H]
    b2d = (b2f[1] - b2f[0]).astype(jnp.float32).reshape(1, 1)            # [1, 1] SMEM scalar

    outT = pl.pallas_call(
        actor_kernel,
        out_shape=jax.ShapeDtypeStruct((N_ACTIONS, Bp), jnp.float32),
        grid=(n_tiles,),
        in_specs=[
            pl.BlockSpec((S + 1, tb), lambda i: (0, i)),          # x_aug^T tile (pipelined)
            pl.BlockSpec((H, S + 1), lambda i: (0, 0)),           # W1_aug (VMEM-resident)
            pl.BlockSpec((1, H), lambda i: (0, 0)),               # w2 difference row
            pl.BlockSpec(memory_space=pltpu.MemorySpace.SMEM),    # b2 difference scalar
        ],
        out_specs=pl.BlockSpec((N_ACTIONS, tb), lambda i: (0, i)),
        compiler_params=pltpu.CompilerParams(
            dimension_semantics=("parallel",),   # v7x: both TensorCores split the batch
        ),
        cost_estimate=pl.CostEstimate(
            flops=2 * Bp * H * (S + 2),
            transcendentals=Bp,
            bytes_accessed=4 * ((S + 1) * Bp + N_ACTIONS * Bp + H * (S + 2) + 1),
        ),
    )(xT, w1a, w2d, b2d)

    if return_transposed:
        return outT[:, :B]        # [2, B]: consumer indexes rows directly (no transpose launch)
    return outT[:, :B].T          # [B, 2]


def init_actor_params(key, state_space):
    """Deterministic init mimicking PyTorch nn.Linear default (uniform +-1/sqrt(fan_in))."""
    k1, k2, k3, k4 = jax.random.split(key, 4)
    lim1 = 1.0 / jnp.sqrt(jnp.float32(state_space))
    lim2 = 1.0 / jnp.sqrt(jnp.float32(HIDDEN))
    w1 = jax.random.uniform(k1, (state_space, HIDDEN), jnp.float32, -lim1, lim1)
    b1 = jax.random.uniform(k2, (1, HIDDEN), jnp.float32, -lim1, lim1)
    w2 = jax.random.uniform(k3, (HIDDEN, N_ACTIONS), jnp.float32, -lim2, lim2)
    b2 = jax.random.uniform(k4, (1, N_ACTIONS), jnp.float32, -lim2, lim2)
    return w1, b1, w2, b2


def _reference(x, w1, b1, w2, b2):
    h = jnp.maximum(x @ w1 + b1, 0.0)
    return jax.nn.softmax(h @ w2 + b2, axis=-1)


if __name__ == "__main__":
    key = jax.random.PRNGKey(0)
    state_space = 4   # CartPole-v0 observation_space.shape[0]
    batch = 8         # rollout-sized batch

    kx, kp, kx2 = jax.random.split(key, 3)
    x = jax.random.normal(kx, (batch, state_space), jnp.float32)
    w1, b1, w2, b2 = init_actor_params(kp, state_space)

    # Small rollout batch (single grid step, tb=128).
    action_prob = jax.block_until_ready(actor_forward(x, w1, b1, w2, b2))
    ref = _reference(x, w1, b1, w2, b2)
    assert action_prob.shape == (batch, N_ACTIONS)
    assert jnp.allclose(action_prob, ref, atol=1e-4, rtol=1e-4)
    assert jnp.allclose(jnp.sum(action_prob, axis=-1), 1.0, atol=1e-5)

    # Training-sized batch with a small tb_max to exercise the multi-tile
    # (even tile count) grid and the padded tail.  Default tb_max=4096 would
    # cover B=1000 in a single step.
    big_batch = 1000
    x_big = jax.random.normal(kx2, (big_batch, state_space), jnp.float32)
    ap_big = jax.block_until_ready(actor_forward(x_big, w1, b1, w2, b2, tb_max=512))
    ref_big = _reference(x_big, w1, b1, w2, b2)
    assert ap_big.shape == (big_batch, N_ACTIONS)
    assert jnp.allclose(ap_big, ref_big, atol=1e-4, rtol=1e-4)
    assert jnp.allclose(jnp.sum(ap_big, axis=-1), 1.0, atol=1e-5)

    # Transposed-output fast path for the inference/sampling consumer.
    apT = jax.block_until_ready(actor_forward(x, w1, b1, w2, b2, return_transposed=True))
    assert apT.shape == (N_ACTIONS, batch)
    assert jnp.allclose(apT.T, ref, atol=1e-4, rtol=1e-4)

    # TODO(synk): Categorical sampling / log_prob (select_action) and the Adam
    # update (learn) are host/optimizer logic, not part of the forward kernel.
    print("KERNEL_OK")
</pallas_src>

<mosaic_0001>
module attributes {stable_mosaic.version = 11 : i64} {
  func.func @actor_kernel(%arg0: i32, %arg1: memref<5x128xf32, #tpu.memory_space<vmem>>, %arg2: memref<128x5xf32, #tpu.memory_space<vmem>>, %arg3: memref<1x128xf32, #tpu.memory_space<vmem>>, %arg4: memref<1x1xf32, #tpu.memory_space<smem>>, %arg5: memref<2x128xf32, #tpu.memory_space<vmem>>) attributes {dimension_semantics = [#tpu.dimension_semantics<parallel>], iteration_bounds = array<i64: 1>, scalar_prefetch = 0 : i64, scratch_operands = 0 : i64, tpu.core_type = #tpu.core_type<tc>, window_params = [{transform_indices = @transform_0, window_bounds = array<i64: 5, 128>}, {pipeline_mode = #tpu.pipeline_mode<synchronous>, transform_indices = @transform_1, window_bounds = array<i64: 128, 5>}, {pipeline_mode = #tpu.pipeline_mode<synchronous>, transform_indices = @transform_2, window_bounds = array<i64: 1, 128>}, {transform_indices = @transform_3, window_bounds = array<i64: 1, 1>}, {transform_indices = @transform_4, window_bounds = array<i64: 2, 128>}]} {
    %c0 = arith.constant 0 : index
    %c0_0 = arith.constant 0 : index
    %0 = vector.load %arg2[%c0, %c0_0] : memref<128x5xf32, #tpu.memory_space<vmem>>, vector<128x5xf32>
    %c0_1 = arith.constant 0 : index
    %c0_2 = arith.constant 0 : index
    %1 = vector.load %arg1[%c0_1, %c0_2] : memref<5x128xf32, #tpu.memory_space<vmem>>, vector<5x128xf32>
    %cst = arith.constant dense<0.000000e+00> : vector<128x128xf32>
    %2 = tpu.matmul %0, %1, %cst {dimension_numbers = #tpu.dot_dimension_numbers<[1], [0], [0], [1], [0, 0, 1, 1], [], []>} : vector<128x5xf32>, vector<5x128xf32>, vector<128x128xf32> -> vector<128x128xf32>
    %cst_3 = arith.constant 0.000000e+00 : f32
    %3 = vector.broadcast %cst_3 : f32 to vector<128x128xf32>
    %4 = arith.maximumf %2, %3 : vector<128x128xf32>
    %c0_4 = arith.constant 0 : index
    %c0_5 = arith.constant 0 : index
    %5 = vector.load %arg3[%c0_4, %c0_5] : memref<1x128xf32, #tpu.memory_space<vmem>>, vector<1x128xf32>
    %cst_6 = arith.constant dense<0.000000e+00> : vector<1x128xf32>
    %6 = tpu.matmul %5, %4, %cst_6 {dimension_numbers = #tpu.dot_dimension_numbers<[1], [0], [0], [1], [0, 0, 1, 1], [], []>} : vector<1x128xf32>, vector<128x128xf32>, vector<1x128xf32> -> vector<1x128xf32>
    %c0_7 = arith.constant 0 : index
    %c0_8 = arith.constant 0 : index
    %7 = memref.load %arg4[%c0_7, %c0_8] : memref<1x1xf32, #tpu.memory_space<smem>>
    %8 = vector.broadcast %7 : f32 to vector<1x128xf32>
    %9 = arith.addf %6, %8 : vector<1x128xf32>
    %10 = math.absf %9 : vector<1x128xf32>
    %cst_9 = arith.constant 0.000000e+00 : f32
    %11 = vector.broadcast %cst_9 : f32 to vector<1x128xf32>
    %12 = arith.subf %11, %10 : vector<1x128xf32>
    %13 = math.exp %12 : vector<1x128xf32>
    %cst_10 = arith.constant 1.000000e+00 : f32
    %14 = vector.broadcast %cst_10 : f32 to vector<1x128xf32>
    %15 = arith.addf %14, %13 : vector<1x128xf32>
    %cst_11 = arith.constant 1.000000e+00 : f32
    %16 = vector.broadcast %cst_11 : f32 to vector<1x128xf32>
    %17 = arith.divf %16, %15 : vector<1x128xf32>
    %18 = arith.mulf %13, %17 : vector<1x128xf32>
    %cst_12 = arith.constant 0.000000e+00 : f32
    %19 = vector.broadcast %cst_12 : f32 to vector<1x128xf32>
    %20 = arith.cmpf oge, %9, %19 : vector<1x128xf32>
    %21 = arith.select %20, %18, %17 : vector<1x128xi1>, vector<1x128xf32>
    %c0_13 = arith.constant 0 : index
    %c0_14 = arith.constant 0 : index
    %22 = vector.load %arg5[%c0_13, %c0_14] : memref<2x128xf32, #tpu.memory_space<vmem>>, vector<1x128xf32>
    tpu.vector_store %arg5[%c0_13, %c0_14], %21 {strides = array<i32>} : memref<2x128xf32, #tpu.memory_space<vmem>>, vector<1x128xf32>,
    %23 = arith.select %20, %17, %18 : vector<1x128xi1>, vector<1x128xf32>
    %c1 = arith.constant 1 : index
    %c0_15 = arith.constant 0 : index
    %24 = vector.load %arg5[%c1, %c0_15] : memref<2x128xf32, #tpu.memory_space<vmem>>, vector<1x128xf32>
    tpu.vector_store %arg5[%c1, %c0_15], %23 {strides = array<i32>} : memref<2x128xf32, #tpu.memory_space<vmem>>, vector<1x128xf32>,
    return
  }
  func.func @transform_0(%arg0: i32) -> (i32, i32) {
    %c0_i32 = arith.constant 0 : i32
    %c0_i32_0 = arith.constant 0 : i32
    return %c0_i32, %arg0 : i32, i32
  }
  func.func @transform_1(%arg0: i32) -> (i32, i32) {
    %c0_i32 = arith.constant 0 : i32
    %c0_i32_0 = arith.constant 0 : i32
    %c0_i32_1 = arith.constant 0 : i32
    return %c0_i32, %c0_i32_0 : i32, i32
  }
  func.func @transform_2(%arg0: i32) -> (i32, i32) {
    %c0_i32 = arith.constant 0 : i32
    %c0_i32_0 = arith.constant 0 : i32
    %c0_i32_1 = arith.constant 0 : i32
    return %c0_i32, %c0_i32_0 : i32, i32
  }
  func.func @transform_3(%arg0: i32) -> (i32, i32) {
    %c0_i32 = arith.constant 0 : i32
    %c0_i32_0 = arith.constant 0 : i32
    %c0_i32_1 = arith.constant 0 : i32
    return %c0_i32, %c0_i32_0 : i32, i32
  }
  func.func @transform_4(%arg0: i32) -> (i32, i32) {
    %c0_i32 = arith.constant 0 : i32
    %c0_i32_0 = arith.constant 0 : i32
    return %c0_i32, %arg0 : i32, i32
  }
}

</mosaic_0001>

<bundles_post_ra>
// kernel: tpu_custom_call.1
= control target key start
LH: loop header
LB: loop body
LE: loop exit
PB: predicated region body
PF: predicated region fallthrough
CT: control target
= control target key end

     0   :  { %vm85_vm0 = vcmask 1044480   ;;  %vm36_vm1 = vcmask 39936   ;;  %s632_s0 = inlined_call_operand.vmem [shape: f32[5,128], index: 0, kind: input, shape index: {}]   ;;  %s633_s1 = inlined_call_operand.vmem [shape: f32[128,5], index: 1, kind: input, shape index: {}]   ;;  %s634_s2 = inlined_call_operand.vmem [shape: f32[1,128], index: 2, kind: input, shape index: {}]   ;;  %s635_s3 = inlined_call_operand.<no memory space> [shape: f32[1,1], index: 3, kind: input, shape index: {}]   ;;  %s636_s4 = inlined_call_operand.hbm [shape: f32[2,128], index: 4, kind: output, shape index: {}]  }
   0x1   :  { %v35_v0 = vld [vmem:[%s632_s0] sm:$0x1f]  ;;  %v20_v2 = vld [vmem:[%s633_s1 + $0x8] sm:$0xff]  ;;  %v21_v3 = vld [vmem:[%s633_s1 + $0x10] sm:$0xff] }
   0x2   :  { %v19_v1 = vld [vmem:[%s633_s1] sm:$0xff]  ;;  %401 = vmatprep.subr.msk.mxu0 %vm85_vm0, %v35_v0  ;;  %v22_v4 = vld [vmem:[%s633_s1 + $0x18] sm:$0xff] }
   0x3   :  { %403 = vmatprep.mubr.msk.f32.mxu0 %vm36_vm1, %v19_v1  ;;  %402 = vmatpush3.msk.msra.mxu0 %vm85_vm0, %v35_v0  ;;  %v23_v5 = vld [vmem:[%s633_s1 + $0x20] sm:$0xff] }
   0x4   :  { %404 = vmatmul.mubr.msk.f32.vlgmr.msra.gmra.mrb[0].mxu0 %vm36_vm1, %v20_v2 }
   0x5   :  { %406 = vmatprep.mubr.msk.f32.mxu0 %vm36_vm1, %v21_v3 }
   0x6   :  { %10 = vsyncpa [#allocation4], 0  ;;  %v24_v6 = vld [vmem:[%s633_s1 + $0x28] sm:$0xff]  ;;  %v25_v7 = vld [vmem:[%s633_s1 + $0x30] sm:$0xff]  ;;  %v518_v17 = vmov 0.0|0.0   ;;  %vm519_vm2 = vmmov 0   ;;  %v252_v60 = vstv %s635_s3 }
   0x7   :  { %v26_v8 = vld [vmem:[%s633_s1 + $0x38] sm:$0xff]  ;;  %v27_v9 = vld [vmem:[%s633_s1 + $0x40] sm:$0xff]  ;;  %v28_v10 = vld [vmem:[%s633_s1 + $0x48] sm:$0xff]  ;;  %462 = vmatprep.subr.bf16.mxu1 %v518_v17  ;;  %v520_v18 = vmov 0.0   ;;  %s521_s24 = smov [#allocation3]  }
   0x8   :  { %407 = vmatmul.mubr.msk.f32.gmra.mrb[2].mxu0 %vm36_vm1, %v22_v4  ;;  %v29_v11 = vld [vmem:[%s633_s1 + $0x50] sm:$0xff]  ;;  %v30_v12 = vld [vmem:[%s633_s1 + $0x58] sm:$0xff]  ;;  %v31_v13 = vld [vmem:[%s633_s1 + $0x60] sm:$0xff]  ;;  %459 = vmatprep.mubr.msk.f32.mxu1 %vm519_vm2, %v520_v18  ;;  %s342_s25 = sshll.u32 %s521_s24, 4  ;;  %s343_s25 = int_to_ptr.vmem [resolvable:$true] %s342_s25 }
   0x9   :  { %409 = vmatprep.mubr.msk.f32.mxu0 %vm36_vm1, %v23_v5  ;;  %v32_v14 = vld [vmem:[%s633_s1 + $0x68] sm:$0xff]  ;;  %v33_v15 = vld [vmem:[%s633_s1 + $0x70] sm:$0xff]  ;;  %v34_v16 = vld [vmem:[%s633_s1 + $0x78] sm:$0xff]  ;;  %p499_p1 = scmp.lt.s32.totalorder %s343_s25, %s343_s25 }
   0xa   :  { %v250_v59 = vld [vmem:[%s634_s2] sm:$0x1]  ;;  %s494_s2 = scalar_lea.vmem %s343_s25, 32 }
   0xb   :  { %p495_p0 = scmp.ne.s32.totalorder %s343_s25, %s494_s2  ;;  %p500_p2 = scmp.lt.s32.totalorder %s494_s2, %s494_s2 }
   0xc   :  { %410 = vmatmul.mubr.msk.f32.gmra.mrb[4].mxu0 %vm36_vm1, %v24_v6 }
   0xd   :  { %412 = vmatprep.mubr.msk.f32.mxu0 %vm36_vm1, %v25_v7  ;;  %p501_p3 = por %p500_p2, %p499_p1 }
   0xf   :  { %p502_p4 = pnand %p501_p3, %p495_p0 }
  0x10   :  { %413 = vmatmul.mubr.msk.f32.gmra.mrb[6].mxu0 %vm36_vm1, %v26_v8 }
  0x11   :  { %415 = vmatprep.mubr.msk.f32.mxu0 %vm36_vm1, %v27_v9 }
  0x14   :  { %416 = vmatmul.mubr.msk.f32.gmra.mrb[8].mxu0 %vm36_vm1, %v28_v10 }
  0x15   :  { %418 = vmatprep.mubr.msk.f32.mxu0 %vm36_vm1, %v29_v11 }
  0x18   :  { %419 = vmatmul.mubr.msk.f32.gmra.mrb[10].mxu0 %vm36_vm1, %v30_v12 }
  0x19   :  { %421 = vmatprep.mubr.msk.f32.mxu0 %vm36_vm1, %v31_v13 }
  0x1c   :  { %422 = vmatmul.mubr.msk.f32.gmra.mrb[12].mxu0 %vm36_vm1, %v32_v14 }
  0x1d   :  { %424 = vmatprep.mubr.msk.f32.mxu0 %vm36_vm1, %v33_v15 }
  0x20   :  { %425 = vmatmul.mubr.msk.f32.gmra.mrb[14].mxu0 %vm36_vm1, %v34_v16 }
  0xd7   :  { %v405_v19 = vpop.f32.mrb[0].mxu0 }
  0xd8   :  { %v235_v20 = vmax.f32 %v405_v19, 0.0  ;;  %v155_v21 = vpop.f32.mrb[1].mxu0 }
  0xd9   :  { %v234_v22 = vmax.f32 %v155_v21, 0.0 }
  0xdb   :  { %v408_v23 = vpop.f32.mrb[2].mxu0  ;;  %v463_v24 = vpack.c.bf16 %v235_v20, %v234_v22 }
  0xdc   :  { %v237_v25 = vmax.f32 %v408_v23, 0.0  ;;  %v165_v26 = vpop.f32.mrb[3].mxu0 }
  0xdd   :  { %v236_v27 = vmax.f32 %v165_v26, 0.0  ;;  %464 = vmatpush3.bf16.msra.mxu1 %v463_v24 }
  0xde   :  { %465 = vmatprep.subr.bf16.mxu1 %v518_v17 }
  0xdf   :  { %v466_v28 = vpack.c.bf16 %v237_v25, %v236_v27  ;;  %v411_v29 = vpop.f32.mrb[4].mxu0 }
  0xe0   :  { %v239_v30 = vmax.f32 %v411_v29, 0.0  ;;  %v175_v31 = vpop.f32.mrb[5].mxu0 }
  0xe1   :  { %v238_v32 = vmax.f32 %v175_v31, 0.0  ;;  %467 = vmatpush3.bf16.msra.mxu1 %v466_v28 }
  0xe2   :  { %468 = vmatprep.subr.bf16.mxu1 %v518_v17 }
  0xe3   :  { %v469_v33 = vpack.c.bf16 %v239_v30, %v238_v32  ;;  %v414_v34 = vpop.f32.mrb[6].mxu0 }
  0xe4   :  { %v241_v35 = vmax.f32 %v414_v34, 0.0  ;;  %v185_v36 = vpop.f32.mrb[7].mxu0 }
  0xe5   :  { %v240_v37 = vmax.f32 %v185_v36, 0.0  ;;  %470 = vmatpush3.bf16.msra.mxu1 %v469_v33 }
  0xe6   :  { %471 = vmatprep.subr.bf16.mxu1 %v518_v17 }
  0xe7   :  { %v472_v38 = vpack.c.bf16 %v241_v35, %v240_v37  ;;  %v417_v39 = vpop.f32.mrb[8].mxu0 }
  0xe8   :  { %v243_v40 = vmax.f32 %v417_v39, 0.0  ;;  %v195_v41 = vpop.f32.mrb[9].mxu0 }
  0xe9   :  { %v242_v42 = vmax.f32 %v195_v41, 0.0  ;;  %473 = vmatpush3.bf16.msra.mxu1 %v472_v38 }
  0xea   :  { %474 = vmatprep.subr.bf16.mxu1 %v518_v17 }
  0xeb   :  { %v475_v43 = vpack.c.bf16 %v243_v40, %v242_v42  ;;  %v420_v44 = vpop.f32.mrb[10].mxu0 }
  0xec   :  { %v245_v45 = vmax.f32 %v420_v44, 0.0  ;;  %v205_v46 = vpop.f32.mrb[11].mxu0 }
  0xed   :  { %v244_v47 = vmax.f32 %v205_v46, 0.0  ;;  %476 = vmatpush3.bf16.msra.mxu1 %v475_v43 }
  0xee   :  { %477 = vmatprep.subr.bf16.mxu1 %v518_v17 }
  0xef   :  { %v478_v48 = vpack.c.bf16 %v245_v45, %v244_v47  ;;  %v423_v49 = vpop.f32.mrb[12].mxu0 }
  0xf0   :  { %v247_v50 = vmax.f32 %v423_v49, 0.0  ;;  %v215_v51 = vpop.f32.mrb[13].mxu0 }
  0xf1   :  { %v246_v52 = vmax.f32 %v215_v51, 0.0  ;;  %479 = vmatpush3.bf16.msra.mxu1 %v478_v48 }
  0xf2   :  { %480 = vmatprep.subr.bf16.mxu1 %v518_v17 }
  0xf3   :  { %v481_v53 = vpack.c.bf16 %v247_v50, %v246_v52  ;;  %v426_v54 = vpop.f32.mrb[14].mxu0 }
  0xf4   :  { %v249_v55 = vmax.f32 %v426_v54, 0.0  ;;  %v225_v56 = vpop.f32.mrb[15].mxu0 }
  0xf5   :  { %v248_v57 = vmax.f32 %v225_v56, 0.0  ;;  %482 = vmatpush3.bf16.msra.mxu1 %v481_v53 }
  0xf6   :  { %483 = vmatprep.subr.bf16.mxu1 %v518_v17 }
  0xf7   :  { %v484_v58 = vpack.c.bf16 %v249_v55, %v248_v57 }
  0xf9   :  { %485 = vmatpush3.bf16.msra.mxu1 %v484_v58 }
  0xfc   :  { %460 = vmatmul.mubr.f32.vlgmr.msra.gmra.mrb[0].mxu1 %v250_v59 }
 0x1cf   :  { %v319_v61 = vpop.f32.mrb[0].mxu1 }
 0x1d0   :  { %v320_v62 = vadd.f32 %v319_v61, %v252_v60  ;;  %v461_v63 = vpop.f32.mrb[1].mxu1 }
 0x1d2   :  { %v323_v0 = vand.u32 2147483647, %v320_v62  ;;  %vm331_vm3 = vcmp.ge.f32.partialorder %v320_v62, 0.0 }
 0x1d4   :  { %v324_v1 = vsub.f32 0.0, %v323_v0 }
 0x1d6   :  { %v325_v2 = vmul.f32 1.442695, %v324_v1 }
 0x1d8   :  { %490 = vpow2.f32 %v325_v2 }
 0x1e2   :  { %v491_v3 = vpop.eup %490 }
 0x1e3   :  { %v327_v4 = vadd.f32 1.0, %v491_v3 }
 0x1e5   :  { %492 = vrcp.f32 %v327_v4 }
 0x1ef   :  { %v493_v5 = vpop.eup %492 }
 0x1f0   :  { %v330_v6 = vmul.f32 %v493_v5, %v491_v3 }
 0x1f2   :  { %v332_v7 = vsel %vm331_vm3, %v330_v6, %v493_v5  ;;  %v334_v8 = vsel %vm331_vm3, %v493_v5, %v330_v6 }
 0x1f3   :  { %333 = vst [vmem:[#allocation3] sm:$0x1] %v332_v7  ;;  %335 = vst [vmem:[#allocation3 + $0x1] sm:$0x1] %v334_v8 }
 0x1f4   :  { %505 = shalt.err (!%p502_p4)
}
 0x1f5   :  { %s506_s27 = scalar_lea.hbm %s636_s4, 32 }
 0x1f6   :  { %p507_p5 = scmp.ne.s32.totalorder %s636_s4, %s506_s27  ;;  %p510_p6 = scmp.lt.u32.totalorder %s506_s27, %s636_s4 }
 0x1f8   :  { %p512_p7 = pnand %p510_p6, %p507_p5 }
 0x1fa   :  { %515 = shalt.err (!%p512_p7)
}
 0x1fb   :  { %345 = dma.vmem_to_hbm [thread:$0]  %s343_s25, 32, %s636_s4, [#allocation4]  }
 0x1fc   :  { %516 = dma.done.wait [#allocation4], 32  }
 0x1fd   :  { %517 = vsyncadd [#allocation4], 4294967264 }
 0x1fe   :  { %349 = vsyncpa [#allocation4], 1 }

</bundles_post_ra>
